<compile_context>
chip_gen: v6e
topology: v6e:2x2x1
jax: 0.10.0
libtpu: 0.0.40
codegen_flags: <defaults>
</compile_context>

<pallas_src>
import jax
import jax.numpy as jnp
from jax.experimental import pallas as pl
from jax.experimental.pallas import tpu as pltpu

HIDDEN = 256
A_SUB = 8             # action dim padded to one sublane group (softmax axis)
NEG_BIG = -1e30       # padded-action logit; exp underflows to exactly 0 in f32
MAX_ROW_TILE = 2048   # states per grid step (lane axis); multiple of 128
MIN_PALLAS_ROWS = 64  # below this, a fused plain-XLA path beats the custom-call overhead


def _round_up(x, m):
    return (x + m - 1) // m * m


def policy_kernel(x_ref, w_ref, b_ref, out_ref):
    """Batch-as-lanes layout.

    x_ref:   (state_dim, T)      one state per lane
    w_ref:   (A_SUB, state_dim)  folded weight (transposed), VMEM-resident across grid steps
    b_ref:   (A_SUB, 1)          folded bias, NEG_BIG in padded action rows
    out_ref: (A_SUB, T)          per-state action probabilities (softmax over sublanes)
    """
    x = x_ref[...]
    w = w_ref[...]
    state_dim = x.shape[0]

    # K = state_dim is tiny: exact f32 contraction on the VPU (no MXU, no bf16 truncation).
    acc = b_ref[...] + w[:, 0:1] * x[0:1, :]
    for k in range(1, state_dim):
        acc = acc + w[:, k:k + 1] * x[k:k + 1, :]

    # Softmax over the 8-sublane action axis; padded rows carry ~-1e30 -> exp() == 0 exactly.
    m = jnp.max(acc, axis=0, keepdims=True)
    e = jnp.exp(acc - m)
    denom = jnp.sum(e, axis=0, keepdims=True)
    out_ref[...] = e / denom  # exact normalization: real-action probs sum to 1


def init_params(key, state_dim, action_dim, hidden=HIDDEN):
    """PyTorch nn.Linear default init: U(-1/sqrt(fan_in), 1/sqrt(fan_in)).
    Weights stored as (in_features, out_features)."""
    ks = jax.random.split(key, 6)

    def lin(kw, kb, fan_in, fan_out):
        bound = 1.0 / jnp.sqrt(jnp.float32(fan_in))
        w = jax.random.uniform(kw, (fan_in, fan_out), jnp.float32, -bound, bound)
        b = jax.random.uniform(kb, (1, fan_out), jnp.float32, -bound, bound)
        return w, b

    w1, b1 = lin(ks[0], ks[1], state_dim, hidden)
    w2, b2 = lin(ks[2], ks[3], hidden, hidden)
    w3, b3 = lin(ks[4], ks[5], hidden, action_dim)
    return (w1, b1, w2, b2, w3, b3)


def fold_params(params):
    """Fold the three affine layers into one (exact; no nonlinearity in the module), then lay the
    folded weight/bias out for the transposed kernel: W^T -> (A_SUB, state_dim) zero-padded rows,
    b -> (A_SUB, 1) with NEG_BIG in padded action rows so the in-kernel softmax ignores them."""
    w1, b1, w2, b2, w3, b3 = params
    hp = jax.lax.Precision.HIGHEST
    w = jnp.dot(jnp.dot(w1, w2, precision=hp), w3, precision=hp)              # (S, A)
    b = jnp.dot(jnp.dot(b1, w2, precision=hp) + b2, w3, precision=hp) + b3    # (1, A)
    s, a = w.shape
    assert a <= A_SUB
    wT = jnp.zeros((A_SUB, s), jnp.float32).at[:a, :].set(w.T)
    bT = jnp.full((A_SUB, 1), NEG_BIG, jnp.float32).at[:a, :].set(b.T)
    return {"w": w, "b": b.reshape(-1), "wT": wT, "bT": bT}


def policy_forward_batched(xb, folded, action_dim, *, force_pallas=False):
    """xb: (N, state_dim) -> (N, action_dim) per-row action probabilities.
    Equivalent to calling the PyTorch module once per row with a 1-D state."""
    n, s = xb.shape
    xb = xb.astype(jnp.float32)

    if n < MIN_PALLAS_ROWS and not force_pallas:
        # Single RL step / tiny batch: one fused XLA op beats the pallas_call boundary.
        logits = xb @ folded["w"] + folded["b"].reshape(1, -1)
        return jax.nn.softmax(logits, axis=-1)[:, :action_dim]

    wT, bT = folded["wT"], folded["bT"]
    xT = xb.T  # (state_dim, N): batch on the lane axis (lane-dense loads AND stores)

    # Lane tile: large to amortize per-grid-step overhead, >= 2 grid steps when possible so the
    # "parallel" axis can shard across v7x's two TensorCores, multiple of 128 for lane density.
    # Pallas masks the partial boundary block itself -> no wrapper-side padding of N.
    n_lane = _round_up(n, 128)
    half = _round_up(pl.cdiv(n_lane, 2), 128)
    row_tile = max(128, min(MAX_ROW_TILE, half))
    grid = (pl.cdiv(n, row_tile),)

    out = pl.pallas_call(
        policy_kernel,
        out_shape=jax.ShapeDtypeStruct((A_SUB, n), jnp.float32),
        grid_spec=pltpu.PrefetchScalarGridSpec(
            num_scalar_prefetch=0,
            grid=grid,
            in_specs=[
                pl.BlockSpec((s, row_tile), lambda i: (0, i)),        # states, tiled over lanes
                pl.BlockSpec((A_SUB, s), lambda i: (0, 0)),           # folded W^T: VMEM-resident
                pl.BlockSpec((A_SUB, 1), lambda i: (0, 0)),           # folded b:   VMEM-resident
            ],
            out_specs=pl.BlockSpec((A_SUB, row_tile), lambda i: (0, i)),  # lane-dense output
        ),
        compiler_params=pltpu.CompilerParams(dimension_semantics=("parallel",)),
        cost_estimate=pl.CostEstimate(
            flops=2 * n * s * A_SUB,
            transcendentals=n * A_SUB,
            bytes_accessed=4 * (s * n + A_SUB * s + A_SUB + A_SUB * n),
        ),
    )(xT, wT, bT)
    return out[:action_dim, :].T  # (N, action_dim)


def policy_forward(x, folded, action_dim):
    """Exact module semantics: x (state_dim,) -> softmax probabilities (action_dim,)."""
    probs = policy_forward_batched(x.reshape(1, -1), folded, action_dim)
    return probs.reshape(action_dim)  # the .squeeze() in the PyTorch forward


def policy_forward_ref(x, params):
    """Pure-JAX unfolded three-layer reference (matches the PyTorch module)."""
    w1, b1, w2, b2, w3, b3 = params
    hp = jax.lax.Precision.HIGHEST
    h = jnp.dot(x.reshape(1, -1), w1, precision=hp) + b1
    h = jnp.dot(h, w2, precision=hp) + b2
    logits = (jnp.dot(h, w3, precision=hp) + b3).reshape(-1)
    return jax.nn.softmax(logits, axis=0)


if __name__ == "__main__":
    state_dim, action_dim = 4, 2  # CartPole-v1 dims

    key = jax.random.PRNGKey(0)
    k_params, k_x, k_xb, k_xl = jax.random.split(key, 4)

    params = init_params(k_params, state_dim, action_dim)
    folded = fold_params(params)

    # --- single state (exact module forward; fused XLA fast path for the RL inner loop) ---
    x = jax.random.normal(k_x, (state_dim,), jnp.float32)
    out = jax.block_until_ready(policy_forward(x, folded, action_dim))
    ref = policy_forward_ref(x, params)
    assert out.shape == (action_dim,)
    assert jnp.allclose(out, ref, atol=1e-3, rtol=1e-3), (out, ref)
    assert abs(float(jnp.sum(out)) - 1.0) < 1e-3

    # --- small batch through the Pallas kernel (grid=1, masked partial boundary block) ---
    batch = 8
    xb = jax.random.normal(k_xb, (batch, state_dim), jnp.float32)
    outb = jax.block_until_ready(
        policy_forward_batched(xb, folded, action_dim, force_pallas=True))
    refb = jnp.stack([policy_forward_ref(xb[i], params) for i in range(batch)])
    assert outb.shape == (batch, action_dim)
    assert jnp.allclose(outb, refb, atol=1e-3, rtol=1e-3), (outb, refb)
    assert jnp.allclose(jnp.sum(outb, axis=-1), 1.0, atol=1e-3)

    # --- larger batch: grid of 2 ("parallel" -> both v7x TCs) + masked boundary block ---
    batch_l = 300
    xl = jax.random.normal(k_xl, (batch_l, state_dim), jnp.float32)
    outl = jax.block_until_ready(
        policy_forward_batched(xl, folded, action_dim, force_pallas=True))
    refl = jax.nn.softmax(xl @ folded["w"] + folded["b"].reshape(1, -1), axis=-1)
    assert outl.shape == (batch_l, action_dim)
    assert jnp.allclose(outl, refl, atol=1e-3, rtol=1e-3)
    assert jnp.allclose(jnp.sum(outl, axis=-1), 1.0, atol=1e-3)

    print("KERNEL_OK")
</pallas_src>

<mosaic_0001>
module attributes {stable_mosaic.version = 11 : i64} {
  func.func @policy_kernel(%arg0: i32, %arg1: memref<4x128xf32, #tpu.memory_space<vmem>>, %arg2: memref<8x4xf32, #tpu.memory_space<vmem>>, %arg3: memref<8x1xf32, #tpu.memory_space<vmem>>, %arg4: memref<8x128xf32, #tpu.memory_space<vmem>>) attributes {dimension_semantics = [#tpu.dimension_semantics<parallel>], iteration_bounds = array<i64: 1>, scalar_prefetch = 0 : i64, scratch_operands = 0 : i64, tpu.core_type = #tpu.core_type<tc>, window_params = [{transform_indices = @transform_0, window_bounds = array<i64: 4, 128>}, {pipeline_mode = #tpu.pipeline_mode<synchronous>, transform_indices = @transform_1, window_bounds = array<i64: 8, 4>}, {pipeline_mode = #tpu.pipeline_mode<synchronous>, transform_indices = @transform_2, window_bounds = array<i64: 8, 1>}, {transform_indices = @transform_3, window_bounds = array<i64: 8, 128>}]} {
    %c0 = arith.constant 0 : index
    %c0_0 = arith.constant 0 : index
    %0 = vector.load %arg1[%c0, %c0_0] : memref<4x128xf32, #tpu.memory_space<vmem>>, vector<4x128xf32>
    %c0_1 = arith.constant 0 : index
    %c0_2 = arith.constant 0 : index
    %1 = vector.load %arg2[%c0_1, %c0_2] : memref<8x4xf32, #tpu.memory_space<vmem>>, vector<8x4xf32>
    %c0_3 = arith.constant 0 : index
    %c0_4 = arith.constant 0 : index
    %2 = vector.load %arg3[%c0_3, %c0_4] : memref<8x1xf32, #tpu.memory_space<vmem>>, vector<8x1xf32>
    %3 = vector.extract_strided_slice %1 {offsets = [0, 0], sizes = [8, 1], strides = [1, 1]} : vector<8x4xf32> to vector<8x1xf32>
    %4 = vector.extract_strided_slice %0 {offsets = [0, 0], sizes = [1, 128], strides = [1, 1]} : vector<4x128xf32> to vector<1x128xf32>
    %5 = vector.broadcast %3 : vector<8x1xf32> to vector<8x128xf32>
    %6 = vector.broadcast %4 : vector<1x128xf32> to vector<8x128xf32>
    %7 = arith.mulf %5, %6 : vector<8x128xf32>
    %8 = vector.broadcast %2 : vector<8x1xf32> to vector<8x128xf32>
    %9 = arith.addf %8, %7 : vector<8x128xf32>
    %10 = vector.extract_strided_slice %1 {offsets = [0, 1], sizes = [8, 1], strides = [1, 1]} : vector<8x4xf32> to vector<8x1xf32>
    %11 = vector.extract_strided_slice %0 {offsets = [1, 0], sizes = [1, 128], strides = [1, 1]} : vector<4x128xf32> to vector<1x128xf32>
    %12 = vector.broadcast %10 : vector<8x1xf32> to vector<8x128xf32>
    %13 = vector.broadcast %11 : vector<1x128xf32> to vector<8x128xf32>
    %14 = arith.mulf %12, %13 : vector<8x128xf32>
    %15 = arith.addf %9, %14 : vector<8x128xf32>
    %16 = vector.extract_strided_slice %1 {offsets = [0, 2], sizes = [8, 1], strides = [1, 1]} : vector<8x4xf32> to vector<8x1xf32>
    %17 = vector.extract_strided_slice %0 {offsets = [2, 0], sizes = [1, 128], strides = [1, 1]} : vector<4x128xf32> to vector<1x128xf32>
    %18 = vector.broadcast %16 : vector<8x1xf32> to vector<8x128xf32>
    %19 = vector.broadcast %17 : vector<1x128xf32> to vector<8x128xf32>
    %20 = arith.mulf %18, %19 : vector<8x128xf32>
    %21 = arith.addf %15, %20 : vector<8x128xf32>
    %22 = vector.extract_strided_slice %1 {offsets = [0, 3], sizes = [8, 1], strides = [1, 1]} : vector<8x4xf32> to vector<8x1xf32>
    %23 = vector.extract_strided_slice %0 {offsets = [3, 0], sizes = [1, 128], strides = [1, 1]} : vector<4x128xf32> to vector<1x128xf32>
    %24 = vector.broadcast %22 : vector<8x1xf32> to vector<8x128xf32>
    %25 = vector.broadcast %23 : vector<1x128xf32> to vector<8x128xf32>
    %26 = arith.mulf %24, %25 : vector<8x128xf32>
    %27 = arith.addf %21, %26 : vector<8x128xf32>
    %cst = arith.constant dense<0xFF800000> : vector<128xf32>
    %28 = vector.multi_reduction <maximumf>, %27, %cst [0] : vector<8x128xf32> to vector<128xf32>
    %29 = vector.shape_cast %28 : vector<128xf32> to vector<1x128xf32>
    %30 = vector.broadcast %29 : vector<1x128xf32> to vector<8x128xf32>
    %31 = arith.subf %27, %30 : vector<8x128xf32>
    %32 = math.exp %31 : vector<8x128xf32>
    %cst_5 = arith.constant dense<0.000000e+00> : vector<128xf32>
    %33 = vector.multi_reduction <add>, %32, %cst_5 [0] : vector<8x128xf32> to vector<128xf32>
    %34 = vector.shape_cast %33 : vector<128xf32> to vector<1x128xf32>
    %35 = vector.broadcast %34 : vector<1x128xf32> to vector<8x128xf32>
    %36 = arith.divf %32, %35 : vector<8x128xf32>
    %c0_6 = arith.constant 0 : index
    %c0_7 = arith.constant 0 : index
    %37 = vector.load %arg4[%c0_6, %c0_7] : memref<8x128xf32, #tpu.memory_space<vmem>>, vector<8x128xf32>
    tpu.vector_store %arg4[%c0_6, %c0_7], %36 {strides = array<i32>} : memref<8x128xf32, #tpu.memory_space<vmem>>, vector<8x128xf32>,
    return
  }
  func.func @transform_0(%arg0: i32) -> (i32, i32) {
    %c0_i32 = arith.constant 0 : i32
    %c0_i32_0 = arith.constant 0 : i32
    return %c0_i32, %arg0 : i32, i32
  }
  func.func @transform_1(%arg0: i32) -> (i32, i32) {
    %c0_i32 = arith.constant 0 : i32
    %c0_i32_0 = arith.constant 0 : i32
    %c0_i32_1 = arith.constant 0 : i32
    return %c0_i32, %c0_i32_0 : i32, i32
  }
  func.func @transform_2(%arg0: i32) -> (i32, i32) {
    %c0_i32 = arith.constant 0 : i32
    %c0_i32_0 = arith.constant 0 : i32
    %c0_i32_1 = arith.constant 0 : i32
    return %c0_i32, %c0_i32_0 : i32, i32
  }
  func.func @transform_3(%arg0: i32) -> (i32, i32) {
    %c0_i32 = arith.constant 0 : i32
    %c0_i32_0 = arith.constant 0 : i32
    return %c0_i32, %arg0 : i32, i32
  }
}

</mosaic_0001>

<bundles_post_ra>
// kernel: tpu_custom_call.1
= control target key start
LH: loop header
LB: loop body
LE: loop exit
PB: predicated region body
PF: predicated region fallthrough
CT: control target
= control target key end

     0   :  { %v131_v1 = vmov 0   ;;  %v132_v2 = vmov 1   ;;  %s168_s0 = inlined_call_operand.vmem [shape: f32[4,8], index: 0, kind: input, shape index: {}]   ;;  %s169_s1 = inlined_call_operand.vmem [shape: f32[8,4], index: 1, kind: input, shape index: {}]   ;;  %s170_s2 = inlined_call_operand.vmem [shape: f32[8,1], index: 2, kind: input, shape index: {}]   ;;  %s171_s3 = inlined_call_operand.hbm [shape: f32[8,8], index: 3, kind: output, shape index: {}]  }
   0x1   :  { %v16_v0 = vld [vmem:[%s169_s1] sm:$0xff]  ;;  %101 = vset.pattern.permute.xlu0 %v131_v1  ;;  %102 = vset.pattern.permute.xlu1 %v132_v2 }
   0x2   :  { %8 = vsyncpa [#allocation3], 0  ;;  %20 = vperm.xlu0 %101, %v16_v0   ;;  %35 = vperm.xlu1 %102, %v16_v0   ;;  %v17_v3 = vld [vmem:[%s170_s2] sm:$0xff]  ;;  %v133_v4 = vmov 2   ;;  %v134_v5 = vmov 3   ;;  %v23_v6 = vlaneseq }
   0x3   :  { %v15_v9 = vld [vmem:[%s168_s0] sm:$0xf]  ;;  %s135_s0 = smov [#allocation2]  }
   0x4   :  { %v24_v7 = vshrl.u32 %v23_v6, 7  ;;  %s88_s2 = sshll.u32 %s135_s0, 4  ;;  %s89_s2 = int_to_ptr.vmem [resolvable:$true] %s88_s2 }
   0x5   :  { %s109_s17 = scalar_lea.vmem %s89_s2, 128  ;;  %p114_p1 = scmp.lt.s32.totalorder %s89_s2, %s89_s2 }
   0x6   :  { %30 = vperm.xlu0 %101, %v17_v3   ;;  %103 = vset.pattern.permute.xlu1 %v133_v4  ;;  %v25_v8 = vsub.s32 0, %v24_v7  ;;  %v40_v10 = vsub.s32 1, %v24_v7  ;;  %v50_v11 = vsub.s32 2, %v24_v7  ;;  %v60_v17 = vsub.s32 3, %v24_v7  ;;  %p110_p0 = scmp.ne.s32.totalorder %s89_s2, %s109_s17  ;;  %p115_p2 = scmp.lt.s32.totalorder %s109_s17, %s109_s17 }
   0x7   :  { %45 = vperm.xlu1 %103, %v16_v0  }
   0x8   :  { %v26_v12 = vrot.slane %v15_v9, %v25_v8  ;;  %v41_v15 = vrot.slane %v15_v9, %v40_v10  ;;  %v51_v16 = vrot.slane %v15_v9, %v50_v11  ;;  %v61_v24 = vrot.slane %v15_v9, %v60_v17  ;;  %p116_p3 = por %p115_p2, %p114_p1 }
   0xa   :  { %104 = vset.pattern.permute.xlu0 %v134_v5  ;;  %p117_p4 = pnand %p116_p3, %p110_p0 }
   0xb   :  { %55 = vperm.xlu0 %104, %v16_v0  }
  0x7d   :  { %v21_v13 = vpop.permute.xlu0 %20  ;;  %v36_v14 = vpop.permute.xlu1 %35 }
  0x7e   :  { %v27_v18 = vmul.f32 %v26_v12, %v21_v13  ;;  %v42_v20 = vmul.f32 %v41_v15, %v36_v14 }
  0x81   :  { %v31_v19 = vpop.permute.xlu0 %30 }
  0x82   :  { %v33_v21 = vadd.f32 %v31_v19, %v27_v18  ;;  %v46_v22 = vpop.permute.xlu1 %45 }
  0x83   :  { %v52_v23 = vmul.f32 %v51_v16, %v46_v22 }
  0x84   :  { %v43_v25 = vadd.f32 %v42_v20, %v33_v21 }
  0x86   :  { %v53_v26 = vadd.f32 %v52_v23, %v43_v25  ;;  %v56_v27 = vpop.permute.xlu0 %55 }
  0x87   :  { %v62_v28 = vmul.f32 %v61_v24, %v56_v27 }
  0x89   :  { %v63_v29 = vadd.f32 %v62_v28, %v53_v26 }
  0x8b   :  { %v64_v30 = vrot.slane %v63_v29, 4 }
  0x8d   :  { %v65_v31 = vmax.f32 %v63_v29, %v64_v30 }
  0x8f   :  { %v66_v32 = vrot.slane %v65_v31, 2 }
  0x91   :  { %v67_v33 = vmax.f32 %v65_v31, %v66_v32 }
  0x93   :  { %v68_v34 = vrot.slane %v67_v33, 1 }
  0x95   :  { %v69_v35 = vmax.f32 %v67_v33, %v68_v34 }
  0x97   :  { %v70_v36 = vsub.f32 %v63_v29, %v69_v35 }
  0x99   :  { %v71_v37 = vmul.f32 1.442695, %v70_v36 }
  0x9b   :  { %105 = vpow2.f32 %v71_v37 }
  0xa8   :  { %v106_v38 = vpop.eup %105 }
  0xa9   :  { %v73_v39 = vrot.slane %v106_v38, 4 }
  0xab   :  { %v74_v40 = vadd.f32 %v106_v38, %v73_v39 }
  0xad   :  { %v75_v41 = vrot.slane %v74_v40, 2 }
  0xaf   :  { %v76_v42 = vadd.f32 %v75_v41, %v74_v40 }
  0xb1   :  { %v77_v43 = vrot.slane %v76_v42, 1 }
  0xb3   :  { %v78_v44 = vadd.f32 %v77_v43, %v76_v42 }
  0xb5   :  { %107 = vrcp.f32 %v78_v44 }
  0xc2   :  { %v108_v45 = vpop.eup %107 }
  0xc3   :  { %v80_v46 = vmul.f32 %v108_v45, %v106_v38 }
  0xc5   :  { %81 = vst [vmem:[#allocation2] sm:$0xff] %v80_v46 }
  0xc6   :  { %120 = shalt.err (!%p117_p4)
}
  0xc7   :  { %91 = dma.vmem_to_hbm [thread:$0]  %s89_s2, 128, %s171_s3, [#allocation3]  }
  0xc8   :  { %129 = dma.done.wait [#allocation3], 128  }
  0xc9   :  { %130 = vsyncadd [#allocation3], 4294967168 }
  0xca   :  { %95 = vsyncpa [#allocation3], 1 }

</bundles_post_ra>
